<compile_context>
chip_gen: v6e
topology: v6e:2x2x1
jax: 0.10.0
libtpu: 0.0.40
codegen_flags: <defaults>
</compile_context>

<pallas_src>
import functools

import jax
import jax.numpy as jnp
from jax.experimental import pallas as pl
from jax.experimental.pallas import tpu as pltpu


def _round_up(n, m):
    return (n + m - 1) // m * m


def _pick_tb(B, target=4096):
    # No wrapper padding: tb is a multiple of 8 (or == B for tiny batches); a ragged
    # final block is handled by Pallas boundary masking.  Cap at ceil(B/2) so the
    # "parallel" batch axis keeps >= 2 grid steps (both v7x TensorCores get work);
    # on v5e/v6e the larger tile just amortizes per-step overhead.
    if B <= 16:
        return B
    half = _round_up(pl.cdiv(B, 2), 8)
    return max(8, min(target, half))


# ---------------------------------------------------------------------------
# classifier_type == 'mlp':  outputs = gating_network(flatten(expert_outputs))
# ---------------------------------------------------------------------------
def _mlp_kernel(x_ref, w_ref, b_ref, o_ref):
    # x: [tb, F] natural batch-major layout; w: [F, O]; b: [1, O]
    # K=12, N=3 is a tiny matmul, but the MXU is otherwise idle (free filler) and this
    # avoids an [O, F, tb] VPU temporary + cross-sublane reduction.
    y = jnp.dot(x_ref[...], w_ref[...], preferred_element_type=jnp.float32)
    o_ref[...] = y + b_ref[...]


def ensemble_mlp_forward(distribution, weight, bias, *, target_tb=4096):
    """distribution: [B, C, E]; weight: [O, C*E] (torch nn.Linear layout); bias: [O]."""
    B, C, E = distribution.shape
    O, F = weight.shape
    assert F == C * E
    # torch's expert_outputs.view(B, -1): logical reshape of contiguous minor dims,
    # not a transpose (no extra HBM pass).
    x = distribution.reshape(B, F).astype(jnp.float32)
    wT = weight.astype(jnp.float32).T            # [F, O]: 36 floats, negligible
    b2 = bias.astype(jnp.float32).reshape(1, O)

    tb = _pick_tb(B, target_tb)
    return pl.pallas_call(
        _mlp_kernel,
        out_shape=jax.ShapeDtypeStruct((B, O), jnp.float32),
        grid=(pl.cdiv(B, tb),),
        in_specs=[
            pl.BlockSpec((tb, F), lambda i: (i, 0)),
            pl.BlockSpec((F, O), lambda i: (0, 0)),
            pl.BlockSpec((1, O), lambda i: (0, 0)),
        ],
        out_specs=pl.BlockSpec((tb, O), lambda i: (i, 0)),
        compiler_params=pltpu.CompilerParams(dimension_semantics=("parallel",)),
    )(x, wT, b2)


# ---------------------------------------------------------------------------
# classifier_type == 'entropy'
# ---------------------------------------------------------------------------
def _entropy_kernel(x_ref, o_ref, *, C, E, topk, temperature):
    # x: [tb, C*E] natural batch-major layout; column f = c*E + e (torch .view order).
    x = x_ref[...]

    # -p*log2(p) for every (class, expert) column at once; p<=0 guarded like torch.where
    # (also guards against garbage in ragged-edge padding rows -- those rows are masked
    # on writeback and every computation here is strictly per-row).
    xp = jnp.where(x > 0, x, 1.0)
    t = jnp.where(x > 0, -x * jnp.log2(xp), 0.0)

    def col(arr, f):                                   # static lane slice -> [tb, 1]
        return arr[:, f:f + 1]

    # per-expert entropy over classes (unrolled: C, E are small static constants)
    ent = []
    for e in range(E):
        acc = col(t, e)
        for c in range(1, C):
            acc = acc + col(t, c * E + e)
        ent.append(acc)                                # E x [tb, 1]

    mn, mx = ent[0], ent[0]
    for e in range(1, E):
        mn = jnp.minimum(mn, ent[e])
        mx = jnp.maximum(mx, ent[e])
    denom = mx - mn
    # max == min would be NaN in torch; produce 0s instead (uniform over first topk).
    inv_d = jnp.where(denom > 0, 1.0 / jnp.where(denom > 0, denom, 1.0), 0.0)
    ne = [(ent[e] - mn) * inv_d for e in range(E)]

    # top-k (smallest normalized entropy) membership via rank; tie -> lower expert
    # index wins, matching torch.topk ordering.  Tie-break is a trace-time Python bool,
    # so no [E,E,TB] iota tensors are ever built.
    keep = []
    for i in range(E):
        rank = None
        for j in range(E):
            if j == i:
                continue
            hit = (ne[j] <= ne[i]) if j < i else (ne[j] < ne[i])
            hit = hit.astype(jnp.int32)
            rank = hit if rank is None else rank + hit
        keep.append(rank < topk)

    # softmax(-ne / T) restricted to the kept experts; EXACT reciprocal so every row's
    # expert weights sum to 1.
    neg_inv_t = jnp.float32(-1.0 / temperature)
    big_neg = jnp.float32(-1e30)
    logits = [jnp.where(keep[e], ne[e] * neg_inv_t, big_neg) for e in range(E)]
    m = logits[0]
    for e in range(1, E):
        m = jnp.maximum(m, logits[e])
    ex = [jnp.exp(logits[e] - m) for e in range(E)]
    s = ex[0]
    for e in range(1, E):
        s = s + ex[e]
    w = [ex[e] / s for e in range(E)]                  # exact normalization

    # prob[:, c] = sum_e distribution[b, c, e] * w[e]
    for c in range(C):
        acc = col(x, c * E) * w[0]
        for e in range(1, E):
            acc = acc + col(x, c * E + e) * w[e]
        o_ref[:, c:c + 1] = acc


def ensemble_entropy_forward(distribution, *, topk, temperature, target_tb=4096):
    """distribution: [B, C, E]  ->  prob [B, C]."""
    B, C, E = distribution.shape
    x = distribution.reshape(B, C * E).astype(jnp.float32)

    tb = _pick_tb(B, target_tb)
    kern = functools.partial(_entropy_kernel, C=C, E=E, topk=int(topk),
                             temperature=float(temperature))
    return pl.pallas_call(
        kern,
        out_shape=jax.ShapeDtypeStruct((B, C), jnp.float32),
        grid=(pl.cdiv(B, tb),),
        in_specs=[pl.BlockSpec((tb, C * E), lambda i: (i, 0))],
        out_specs=pl.BlockSpec((tb, C), lambda i: (i, 0)),
        compiler_params=pltpu.CompilerParams(dimension_semantics=("parallel",)),
    )(x)


# ---------------------------------------------------------------------------
# main
# ---------------------------------------------------------------------------
if __name__ == "__main__":
    key = jax.random.PRNGKey(0)
    k1, k2, k3 = jax.random.split(key, 3)

    B, C, E = 256, 3, 4               # batch, num_classes (expert output_size), num_experts
    input_size, output_size = C * E, 3
    topk, temperature = 2, 1.0

    # expert probability distributions (each expert's pred_prob): softmax over classes
    logits = jax.random.normal(k1, (B, C, E), dtype=jnp.float32)
    distribution = jax.nn.softmax(logits, axis=1)

    # deterministic gating_network = nn.Linear(input_size, output_size) parameters
    W = jax.random.normal(k2, (output_size, input_size), dtype=jnp.float32) * 0.1
    b = jax.random.normal(k3, (output_size,), dtype=jnp.float32) * 0.1

    out_mlp = ensemble_mlp_forward(distribution, W, b)
    out_ent = ensemble_entropy_forward(distribution, topk=topk, temperature=temperature)
    jax.block_until_ready((out_mlp, out_ent))

    # ---- plain-JAX reference checks ----
    ref_mlp = distribution.reshape(B, -1) @ W.T + b

    p = jnp.transpose(distribution, (0, 2, 1))                   # [B, E, C]
    ent = jnp.sum(jnp.where(p > 0, -p * jnp.log2(jnp.where(p > 0, p, 1.0)), 0.0), axis=-1)
    ne = (ent - ent.min(axis=1, keepdims=True)) / (
        ent.max(axis=1, keepdims=True) - ent.min(axis=1, keepdims=True)
    )
    _, idx = jax.lax.top_k(-ne, topk)                            # topk smallest
    result = jnp.full_like(ent, jnp.inf)
    result = result.at[jnp.arange(B)[:, None], idx].set(
        jnp.take_along_axis(ne, idx, axis=1)
    )
    weight = jax.nn.softmax(-result / temperature, axis=-1)[..., None]
    ref_ent = jnp.sum(p * weight, axis=1)

    # mlp tolerance covers MXU f32-via-bf16-pass emulation vs. the XLA reference matmul.
    assert jnp.allclose(out_mlp, ref_mlp, atol=2e-3), "mlp path mismatch"
    # entropy path is exact math now (no approx reciprocal).
    assert jnp.allclose(out_ent, ref_ent, atol=1e-4), "entropy path mismatch"

    print("KERNEL_OK")
</pallas_src>

<mosaic_0001>
module attributes {stable_mosaic.version = 11 : i64} {
  func.func @_mlp_kernel(%arg0: i32, %arg1: memref<128x12xf32, #tpu.memory_space<vmem>>, %arg2: memref<12x3xf32, #tpu.memory_space<vmem>>, %arg3: memref<1x3xf32, #tpu.memory_space<vmem>>, %arg4: memref<128x3xf32, #tpu.memory_space<vmem>>) attributes {dimension_semantics = [#tpu.dimension_semantics<parallel>], iteration_bounds = array<i64: 2>, scalar_prefetch = 0 : i64, scratch_operands = 0 : i64, tpu.core_type = #tpu.core_type<tc>, window_params = [{transform_indices = @transform_0, window_bounds = array<i64: 128, 12>}, {pipeline_mode = #tpu.pipeline_mode<synchronous>, transform_indices = @transform_1, window_bounds = array<i64: 12, 3>}, {pipeline_mode = #tpu.pipeline_mode<synchronous>, transform_indices = @transform_2, window_bounds = array<i64: 1, 3>}, {transform_indices = @transform_3, window_bounds = array<i64: 128, 3>}]} {
    %c0 = arith.constant 0 : index
    %c0_0 = arith.constant 0 : index
    %0 = vector.load %arg1[%c0, %c0_0] : memref<128x12xf32, #tpu.memory_space<vmem>>, vector<128x12xf32>
    %c0_1 = arith.constant 0 : index
    %c0_2 = arith.constant 0 : index
    %1 = vector.load %arg2[%c0_1, %c0_2] : memref<12x3xf32, #tpu.memory_space<vmem>>, vector<12x3xf32>
    %cst = arith.constant dense<0.000000e+00> : vector<128x3xf32>
    %2 = tpu.matmul %0, %1, %cst {dimension_numbers = #tpu.dot_dimension_numbers<[1], [0], [0], [1], [0, 0, 1, 1], [], []>} : vector<128x12xf32>, vector<12x3xf32>, vector<128x3xf32> -> vector<128x3xf32>
    %c0_3 = arith.constant 0 : index
    %c0_4 = arith.constant 0 : index
    %3 = vector.load %arg3[%c0_3, %c0_4] : memref<1x3xf32, #tpu.memory_space<vmem>>, vector<1x3xf32>
    %4 = vector.broadcast %3 : vector<1x3xf32> to vector<128x3xf32>
    %5 = arith.addf %2, %4 : vector<128x3xf32>
    %c0_5 = arith.constant 0 : index
    %c0_6 = arith.constant 0 : index
    %6 = vector.load %arg4[%c0_5, %c0_6] : memref<128x3xf32, #tpu.memory_space<vmem>>, vector<128x3xf32>
    tpu.vector_store %arg4[%c0_5, %c0_6], %5 {strides = array<i32>} : memref<128x3xf32, #tpu.memory_space<vmem>>, vector<128x3xf32>,
    return
  }
  func.func @transform_0(%arg0: i32) -> (i32, i32) {
    %c0_i32 = arith.constant 0 : i32
    %c0_i32_0 = arith.constant 0 : i32
    return %arg0, %c0_i32 : i32, i32
  }
  func.func @transform_1(%arg0: i32) -> (i32, i32) {
    %c0_i32 = arith.constant 0 : i32
    %c0_i32_0 = arith.constant 0 : i32
    %c0_i32_1 = arith.constant 0 : i32
    return %c0_i32, %c0_i32_0 : i32, i32
  }
  func.func @transform_2(%arg0: i32) -> (i32, i32) {
    %c0_i32 = arith.constant 0 : i32
    %c0_i32_0 = arith.constant 0 : i32
    %c0_i32_1 = arith.constant 0 : i32
    return %c0_i32, %c0_i32_0 : i32, i32
  }
  func.func @transform_3(%arg0: i32) -> (i32, i32) {
    %c0_i32 = arith.constant 0 : i32
    %c0_i32_0 = arith.constant 0 : i32
    return %arg0, %c0_i32 : i32, i32
  }
}

</mosaic_0001>

<bundles_post_ra>
// kernel: tpu_custom_call.1
= control target key start
LH: loop header
LB: loop body
LE: loop exit
PB: predicated region body
PF: predicated region fallthrough
CT: control target
= control target key end

     0   :  { %s585_s12 = smov 0   ;;  %s668_s0 = inlined_call_operand.vmem [shape: f32[256,12], index: 0, kind: input, shape index: {}]   ;;  %s669_s1 = inlined_call_operand.vmem [shape: f32[12,3], index: 1, kind: input, shape index: {}]   ;;  %s670_s2 = inlined_call_operand.vmem [shape: f32[1,3], index: 2, kind: input, shape index: {}]   ;;  %s671_s3 = inlined_call_operand.vmem [shape: f32[256,3], index: 3, kind: output, shape index: {}]  }
   0x1 LB: > { %s470_s13 = sadd.s32 4294967295, %s563_s12   ;;  %p474_p0 = scmp.ge.s32.totalorder %s563_s12, 1  ;;  %s563_s12 = sphi %s585_s12, %s13_s12  }
   0x2   : > { %p138_p1 = scmp.lt.s32.totalorder %s563_s12, 3 }
   0x4   : > { %p139_p2 = pnand %p474_p0, %p138_p1 }
   0x5   : > { %s475_s18 = sshll.u32 (!%p139_p2), %s470_s13, 4 }
   0x6   : > { %142 = sbr.rel (%p139_p2) target bundleno = 227 (0xe3), region = 32  ;;  %p163_p3 = scmp.lt.s32.totalorder (!%p139_p2), %s475_s18, 31 }
   0xb   : > { %v191_v0 = vld [vmem:[%s669_s1 + $0x8] sm:$0xf]  ;;  %vm248_vm0 = vcmask 1043456   ;;  %v190_v1 = vld [vmem:[%s669_s1] sm:$0xff]  ;;  %s673_s18 = smov (!%p163_p3, %s475_s18), 31  ;;  %vm199_vm1 = vcmask 97280  }
   0xc   : > { %517 = vmatprep.subr.msk.mxu0 %vm248_vm0, %v191_v0  ;;  %545 = vmatprep.subr.msk.mxu1 %vm248_vm0, %v191_v0  ;;  %s476_s19 = sshll.u32 %s673_s18, 3  ;;  %v479_v18 = vld [vmem:[%s670_s2] ss:$0 sm:$0xff]  ;;  %vm397_vm2 = vcmask 23552  }
   0xd   : > { %518 = vmatpush3.msk.msra.mxu0 %vm248_vm0, %v191_v0  ;;  %547 = vmatpush3.msk.msra.mxu1 %vm248_vm0, %v191_v0  ;;  %s166_s22 = scalar_lea.vmem %s668_s0, %s476_s19  ;;  %s631_s27 = scalar_lea.vmem %s671_s3, %s476_s19 }
   0xe   : > { %519 = vmatprep.subr.mxu0 %v190_v1  ;;  %546 = vmatprep.subr.mxu1 %v190_v1  ;;  %v174_v2 = vld [vmem:[%s166_s22] sm:$0xff]  ;;  %v175_v4 = vld [vmem:[%s166_s22 + $0x8] sm:$0xff]  ;;  %v176_v6 = vld [vmem:[%s166_s22 + $0x10] sm:$0xff] }
   0xf   : > { %520 = vmatpush3.msra.mxu0 %v190_v1  ;;  %548 = vmatpush3.msra.mxu1 %v190_v1  ;;  %v182_v3 = vld [vmem:[%s166_s22 + $0x40] sm:$0xff]  ;;  %v183_v5 = vld [vmem:[%s166_s22 + $0x48] sm:$0xff]  ;;  %v184_v7 = vld [vmem:[%s166_s22 + $0x50] sm:$0xff] }
  0x10   : > { %521 = vmatprep.mubr.msk.f32.mxu0 %vm199_vm1, %v174_v2  ;;  %533 = vmatprep.mubr.msk.f32.mxu1 %vm199_vm1, %v182_v3  ;;  %v177_v8 = vld [vmem:[%s166_s22 + $0x18] sm:$0xff]  ;;  %v178_v10 = vld [vmem:[%s166_s22 + $0x20] sm:$0xff]  ;;  %v179_v12 = vld [vmem:[%s166_s22 + $0x28] sm:$0xff] }
  0x11   : > { %522 = vmatmul.mubr.msk.f32.vlgmr.msra.gmra.mxu0 %vm199_vm1, %v175_v4  ;;  %534 = vmatmul.mubr.msk.f32.vlgmr.msra.gmra.mxu1 %vm199_vm1, %v183_v5  ;;  %v185_v9 = vld [vmem:[%s166_s22 + $0x58] sm:$0xff]  ;;  %v186_v11 = vld [vmem:[%s166_s22 + $0x60] sm:$0xff]  ;;  %v187_v13 = vld [vmem:[%s166_s22 + $0x68] sm:$0xff] }
  0x12   : > { %524 = vmatprep.mubr.msk.f32.mxu0 %vm199_vm1, %v176_v6  ;;  %536 = vmatprep.mubr.msk.f32.mxu1 %vm199_vm1, %v184_v7  ;;  %v180_v14 = vld [vmem:[%s166_s22 + $0x30] sm:$0xff]  ;;  %v181_v16 = vld [vmem:[%s166_s22 + $0x38] sm:$0xff] }
  0x13   : > { %v188_v15 = vld [vmem:[%s166_s22 + $0x70] sm:$0xff]  ;;  %v189_v17 = vld [vmem:[%s166_s22 + $0x78] sm:$0xff] }
  0x15   : > { %525 = vmatmul.mubr.msk.f32.gmra.mxu0 %vm199_vm1, %v177_v8  ;;  %537 = vmatmul.mubr.msk.f32.gmra.mxu1 %vm199_vm1, %v185_v9 }
  0x16   : > { %527 = vmatprep.mubr.msk.f32.mxu0 %vm199_vm1, %v178_v10  ;;  %539 = vmatprep.mubr.msk.f32.mxu1 %vm199_vm1, %v186_v11 }
  0x19   : > { %528 = vmatmul.mubr.msk.f32.gmra.mxu0 %vm199_vm1, %v179_v12  ;;  %540 = vmatmul.mubr.msk.f32.gmra.mxu1 %vm199_vm1, %v187_v13 }
  0x1a   : > { %530 = vmatprep.mubr.msk.f32.mxu0 %vm199_vm1, %v180_v14  ;;  %542 = vmatprep.mubr.msk.f32.mxu1 %vm199_vm1, %v188_v15 }
  0x1d   : > { %531 = vmatmul.mubr.msk.f32.gmra.mxu0 %vm199_vm1, %v181_v16  ;;  %543 = vmatmul.mubr.msk.f32.gmra.mxu1 %vm199_vm1, %v189_v17 }
  0xd1   : > { %v523_v19 = vpop.f32.mrf.mxu0  ;;  %v535_v20 = vpop.f32.mrf.mxu1 }
  0xd2   : > { %v324_v21 = vadd.f32 %v523_v19, %v479_v18  ;;  %v364_v22 = vadd.f32 %v535_v20, %v479_v18 }
  0xd3   : > { %v318_v23 = vpop.f32.mrf.mxu0  ;;  %v358_v24 = vpop.f32.mrf.mxu1 }
  0xd4   : > { %399 = vst.msk [vmem:[%s631_s27 + $0x8] sm:$0xff] %vm397_vm2, %v324_v21  ;;  %407 = vst.msk [vmem:[%s631_s27 + $0x48] sm:$0xff] %vm397_vm2, %v364_v22  ;;  %v319_v25 = vadd.f32 %v479_v18, %v318_v23  ;;  %v359_v26 = vadd.f32 %v479_v18, %v358_v24 }
  0xd5   : > { %v526_v27 = vpop.f32.mrf.mxu0  ;;  %v538_v28 = vpop.f32.mrf.mxu1 }
  0xd6   : > { %398 = vst.msk [vmem:[%s631_s27] sm:$0xff] %vm397_vm2, %v319_v25  ;;  %406 = vst.msk [vmem:[%s631_s27 + $0x40] sm:$0xff] %vm397_vm2, %v359_v26  ;;  %v334_v29 = vadd.f32 %v526_v27, %v479_v18  ;;  %v374_v30 = vadd.f32 %v538_v28, %v479_v18 }
  0xd7   : > { %v328_v31 = vpop.f32.mrf.mxu0  ;;  %v368_v32 = vpop.f32.mrf.mxu1 }
  0xd8   : > { %401 = vst.msk [vmem:[%s631_s27 + $0x18] sm:$0xff] %vm397_vm2, %v334_v29  ;;  %409 = vst.msk [vmem:[%s631_s27 + $0x58] sm:$0xff] %vm397_vm2, %v374_v30  ;;  %v329_v33 = vadd.f32 %v479_v18, %v328_v31  ;;  %v369_v34 = vadd.f32 %v479_v18, %v368_v32 }
  0xd9   : > { %v529_v35 = vpop.f32.mrf.mxu0  ;;  %v541_v36 = vpop.f32.mrf.mxu1 }
  0xda   : > { %400 = vst.msk [vmem:[%s631_s27 + $0x10] sm:$0xff] %vm397_vm2, %v329_v33  ;;  %408 = vst.msk [vmem:[%s631_s27 + $0x50] sm:$0xff] %vm397_vm2, %v369_v34  ;;  %v344_v37 = vadd.f32 %v529_v35, %v479_v18  ;;  %v384_v38 = vadd.f32 %v541_v36, %v479_v18 }
  0xdb   : > { %v338_v39 = vpop.f32.mrf.mxu0  ;;  %v378_v40 = vpop.f32.mrf.mxu1 }
  0xdc   : > { %403 = vst.msk [vmem:[%s631_s27 + $0x28] sm:$0xff] %vm397_vm2, %v344_v37  ;;  %411 = vst.msk [vmem:[%s631_s27 + $0x68] sm:$0xff] %vm397_vm2, %v384_v38  ;;  %v339_v41 = vadd.f32 %v479_v18, %v338_v39  ;;  %v379_v42 = vadd.f32 %v479_v18, %v378_v40 }
  0xdd   : > { %v532_v43 = vpop.f32.mrf.mxu0  ;;  %v544_v44 = vpop.f32.mrf.mxu1 }
  0xde   : > { %402 = vst.msk [vmem:[%s631_s27 + $0x20] sm:$0xff] %vm397_vm2, %v339_v41  ;;  %410 = vst.msk [vmem:[%s631_s27 + $0x60] sm:$0xff] %vm397_vm2, %v379_v42  ;;  %v354_v45 = vadd.f32 %v532_v43, %v479_v18  ;;  %v394_v46 = vadd.f32 %v544_v44, %v479_v18 }
  0xdf   : > { %v348_v47 = vpop.f32.mrf.mxu0  ;;  %v388_v48 = vpop.f32.mrf.mxu1 }
  0xe0   : > { %405 = vst.msk [vmem:[%s631_s27 + $0x38] sm:$0xff] %vm397_vm2, %v354_v45  ;;  %413 = vst.msk [vmem:[%s631_s27 + $0x78] sm:$0xff] %vm397_vm2, %v394_v46  ;;  %v349_v49 = vadd.f32 %v479_v18, %v348_v47  ;;  %v389_v50 = vadd.f32 %v479_v18, %v388_v48 }
  0xe2   : > { %404 = vst.msk [vmem:[%s631_s27 + $0x30] sm:$0xff] %vm397_vm2, %v349_v49  ;;  %412 = vst.msk [vmem:[%s631_s27 + $0x70] sm:$0xff] %vm397_vm2, %v389_v50 }
  0xe3 PF: > { %s13_s12 = sadd.s32 1, %s563_s12  }
  0xe4   : > { %p10_p4 = scmp.ge.s32.totalorder %s13_s12, 4  }
  0xe6   :  { %12 = sbr.rel (!%p10_p4) target bundleno = 1 (0x1), region = 62 }

</bundles_post_ra>
